<compile_context>
chip_gen: v7x
topology: tpu7x:2x2x1
jax: 0.10.0
libtpu: 0.0.40
codegen_flags: <defaults>
</compile_context>

<pallas_src>
import jax
import jax.numpy as jnp
from jax.experimental import pallas as pl
from jax.experimental.pallas import tpu as pltpu


def _round_up(x, m):
    return (x + m - 1) // m * m


def _make_conv_kernel(*, ipb, cin, cin_pad, h, w, wp, l_pad, halo,
                      compute_dtype):
    """Build the per-grid-step conv kernel (closure over static dims)."""

    def kernel(x_ref, w_ref, o_ref, xs_ref, p_ref):
        # x_ref : (ipb, cin, h, w)        raw input images (input dtype)
        # w_ref : (cout, 9*cin_pad)       weights, columns ordered (kh, kw, ci)
        # o_ref : (ipb, cout, l_pad)      conv output on padded grid (bf16)
        # xs_ref: (cin, lext_pad)         scratch: padded flattened image
        # p_ref : (9*cin_pad, ipb*l_pad)  scratch: im2col matrix
        #
        # Zero scratch every step: cheap, and megacore-safe (each core only
        # executes a subset of grid steps, so "zero on step 0" would be wrong).
        xs_ref[...] = jnp.zeros_like(xs_ref)
        p_ref[...] = jnp.zeros_like(p_ref)

        # Cast the whole input block to the compute dtype once.
        xb = x_ref[...].astype(compute_dtype)          # (ipb, cin, h, w)

        for b in range(ipb):
            # Build the zero-padded, flattened image for image b in VMEM.
            # Only interior rows are written; the SAME-padding ring, the halo
            # and the lane padding stay zero.
            for r in range(h):
                col0 = halo + (r + 1) * wp + 1
                xs_ref[:, col0:col0 + w] = xb[b, :, r, :]
            # im2col: a 3x3 tap shift is a static lane-offset slice of xs.
            # (Could be pltpu.roll of the centre slab to move the shifts onto
            # the XLU; static slices kept for simplicity.)
            for kh in range(3):
                for kw in range(3):
                    t = kh * 3 + kw
                    s0 = kh * wp + kw
                    p_ref[t * cin_pad:t * cin_pad + cin,
                          b * l_pad:(b + 1) * l_pad] = xs_ref[:, s0:s0 + l_pad]

        # One MXU matmul over all taps / channels / images, f32 accumulation.
        res = jnp.dot(w_ref[...], p_ref[...],
                      preferred_element_type=jnp.float32)
        for b in range(ipb):
            o_ref[b] = res[:, b * l_pad:(b + 1) * l_pad].astype(o_ref.dtype)

    return kernel


def pixel_shuffle(x_nchw, r):
    """torch.nn.PixelShuffle semantics on NCHW."""
    n, c, h, w = x_nchw.shape
    c_out = c // (r * r)
    y = x_nchw.reshape(n, c_out, r, r, h, w)
    y = jnp.transpose(y, (0, 1, 4, 2, 5, 3))      # N, C', H, r, W, r
    return y.reshape(n, c_out, h * r, w * r)


def upsample_forward(x, weight, *, compute_dtype=jnp.bfloat16,
                     images_per_step=1):
    """Upsample.forward: Conv2d(n_feat, 2*n_feat, 3, pad=1, bias=False) + PixelShuffle(2).

    x: (N, Cin, H, W) NCHW.  weight: (Cout=2*Cin, Cin, 3, 3), no bias.
    Returns (N, Cin // 2, 2H, 2W) in x.dtype.
    """
    n, cin, h, w = x.shape
    cout = weight.shape[0]
    out_dtype = x.dtype

    ipb = images_per_step if (images_per_step > 0 and n % images_per_step == 0) else 1

    hp, wp = h + 2, w + 2
    length = hp * wp                              # flattened padded image length
    l_pad = _round_up(length, 128)                # lane-dense minor dim
    halo = wp + 1                                 # zero halo before pixel 0
    lext_pad = _round_up(l_pad + 2 * halo, 128)   # scratch image length

    # Sublane-aligned tap channel blocks (16 rows per packed bf16 vreg).
    pack = 16 if jnp.dtype(compute_dtype).itemsize == 2 else 8
    cin_pad = _round_up(cin, pack)

    # (Cout, Cin, 3, 3) -> (Cout, 3, 3, Cin_pad) -> (Cout, 9*Cin_pad); the
    # zero columns for padded channels match the zeroed im2col pad rows, and
    # the (kh, kw, ci) column order matches the im2col row order in-kernel.
    w_mat = jnp.transpose(weight, (0, 2, 3, 1))
    w_mat = jnp.pad(w_mat, ((0, 0), (0, 0), (0, 0), (0, cin_pad - cin)))
    w_mat = w_mat.reshape(cout, 9 * cin_pad).astype(compute_dtype)

    kernel = _make_conv_kernel(ipb=ipb, cin=cin, cin_pad=cin_pad, h=h, w=w,
                               wp=wp, l_pad=l_pad, halo=halo,
                               compute_dtype=compute_dtype)

    flops = 2 * n * cout * l_pad * 9 * cin_pad
    bytes_accessed = (x.size * x.dtype.itemsize
                      + w_mat.size * w_mat.dtype.itemsize
                      + n * cout * l_pad * jnp.dtype(compute_dtype).itemsize)

    conv_flat = pl.pallas_call(
        kernel,
        out_shape=jax.ShapeDtypeStruct((n, cout, l_pad), compute_dtype),
        grid_spec=pltpu.PrefetchScalarGridSpec(
            num_scalar_prefetch=0,
            grid=(n // ipb,),
            in_specs=[
                pl.BlockSpec((ipb, cin, h, w), lambda b: (b, 0, 0, 0)),
                pl.BlockSpec((cout, 9 * cin_pad), lambda b: (0, 0)),
            ],
            out_specs=pl.BlockSpec((ipb, cout, l_pad), lambda b: (b, 0, 0)),
            scratch_shapes=[
                pltpu.VMEM((cin, lext_pad), compute_dtype),
                pltpu.VMEM((9 * cin_pad, ipb * l_pad), compute_dtype),
            ],
        ),
        compiler_params=pltpu.CompilerParams(
            dimension_semantics=("parallel",),
            vmem_limit_bytes=48 * 1024 * 1024,
        ),
        cost_estimate=pl.CostEstimate(
            flops=flops, transcendentals=0, bytes_accessed=bytes_accessed),
    )(x, w_mat)

    # Drop lane padding + garbage border pixels, PixelShuffle(2), upcast last.
    conv = conv_flat[:, :, :length].reshape(n, cout, hp, wp)[:, :, 1:h + 1, 1:w + 1]
    return pixel_shuffle(conv, 2).astype(out_dtype)


if __name__ == "__main__":
    key = jax.random.PRNGKey(0)
    k_x, k_w = jax.random.split(key)

    # Small shapes consistent with the module: batch=2, n_feat=4, spatial=16.
    N, n_feat, H, W = 2, 4, 16, 16
    x = jax.random.normal(k_x, (N, n_feat, H, W), dtype=jnp.float32)

    # Deterministic Conv2d weight: (2*n_feat, n_feat, 3, 3), no bias.
    fan_in = n_feat * 3 * 3
    bound = 1.0 / (fan_in ** 0.5)
    weight = jax.random.uniform(
        k_w, (2 * n_feat, n_feat, 3, 3), minval=-bound, maxval=bound,
        dtype=jnp.float32)

    # Default path: one image per grid step (batch axis stays "parallel" so
    # v7x megacore can split it across its two TensorCores).
    out = jax.block_until_ready(jax.jit(upsample_forward)(x, weight))
    assert out.shape == (N, n_feat // 2, 2 * H, 2 * W), out.shape

    # Folded path: whole batch behind one weight push / one grid step
    # (recommended on single-TC v5e/v6e).
    out_folded = jax.block_until_ready(
        jax.jit(lambda a, b: upsample_forward(a, b, images_per_step=N))(x, weight))
    assert out_folded.shape == out.shape, out_folded.shape

    # Reference: XLA conv on bf16-rounded operands (the kernel computes
    # bf16 x bf16 with f32 accumulation and stores the conv in bf16), then
    # PixelShuffle.
    xq = x.astype(jnp.bfloat16).astype(jnp.float32)
    wq = weight.astype(jnp.bfloat16).astype(jnp.float32)
    ref_conv = jax.lax.conv_general_dilated(
        xq, wq, window_strides=(1, 1), padding="SAME",
        dimension_numbers=("NCHW", "OIHW", "NCHW"),
        precision=jax.lax.Precision.HIGHEST)
    ref_conv = ref_conv.astype(jnp.bfloat16).astype(jnp.float32)
    ref_out = pixel_shuffle(ref_conv, 2)

    err1 = float(jnp.max(jnp.abs(out - ref_out)))
    err2 = float(jnp.max(jnp.abs(out_folded - ref_out)))
    assert jnp.allclose(out, ref_out, atol=2e-2, rtol=2e-2), err1
    assert jnp.allclose(out_folded, ref_out, atol=2e-2, rtol=2e-2), err2

    print("KERNEL_OK")
</pallas_src>

<mosaic_0001>
module attributes {stable_mosaic.version = 11 : i64} {
  func.func @kernel(%arg0: i32, %arg1: memref<1x4x16x16xf32, #tpu.memory_space<vmem>>, %arg2: memref<8x144xbf16, #tpu.memory_space<vmem>>, %arg3: memref<1x8x384xbf16, #tpu.memory_space<vmem>>, %arg4: memref<4x512xbf16, #tpu.memory_space<vmem>>, %arg5: memref<144x384xbf16, #tpu.memory_space<vmem>>) attributes {dimension_semantics = [#tpu.dimension_semantics<parallel>], iteration_bounds = array<i64: 2>, scalar_prefetch = 0 : i64, scratch_operands = 2 : i64, tpu.core_type = #tpu.core_type<tc>, window_params = [{transform_indices = @transform_0, window_bounds = array<i64: 1, 4, 16, 16>}, {pipeline_mode = #tpu.pipeline_mode<synchronous>, transform_indices = @transform_1, window_bounds = array<i64: 8, 144>}, {transform_indices = @transform_2, window_bounds = array<i64: 1, 8, 384>}]} {
    %cst = arith.constant 0.000000e+00 : bf16
    %0 = vector.broadcast %cst : bf16 to vector<4x512xbf16>
    %c0 = arith.constant 0 : index
    %c0_0 = arith.constant 0 : index
    %1 = vector.load %arg4[%c0, %c0_0] : memref<4x512xbf16, #tpu.memory_space<vmem>>, vector<4x512xbf16>
    tpu.vector_store %arg4[%c0, %c0_0], %0 {strides = array<i32>} : memref<4x512xbf16, #tpu.memory_space<vmem>>, vector<4x512xbf16>,
    %cst_1 = arith.constant 0.000000e+00 : bf16
    %2 = vector.broadcast %cst_1 : bf16 to vector<144x384xbf16>
    %c0_2 = arith.constant 0 : index
    %c0_3 = arith.constant 0 : index
    %3 = vector.load %arg5[%c0_2, %c0_3] : memref<144x384xbf16, #tpu.memory_space<vmem>>, vector<144x384xbf16>
    tpu.vector_store %arg5[%c0_2, %c0_3], %2 {strides = array<i32>} : memref<144x384xbf16, #tpu.memory_space<vmem>>, vector<144x384xbf16>,
    %c0_4 = arith.constant 0 : index
    %c0_5 = arith.constant 0 : index
    %c0_6 = arith.constant 0 : index
    %c0_7 = arith.constant 0 : index
    %4 = vector.load %arg1[%c0_4, %c0_5, %c0_6, %c0_7] : memref<1x4x16x16xf32, #tpu.memory_space<vmem>>, vector<1x4x16x16xf32>
    %5 = arith.truncf %4 : vector<1x4x16x16xf32> to vector<1x4x16x16xbf16>
    %6 = vector.extract_strided_slice %5 {offsets = [0, 0, 0, 0], sizes = [1, 4, 1, 16], strides = [1, 1, 1, 1]} : vector<1x4x16x16xbf16> to vector<1x4x1x16xbf16>
    %7 = vector.shape_cast %6 : vector<1x4x1x16xbf16> to vector<4x16xbf16>
    %c0_8 = arith.constant 0 : index
    %c38 = arith.constant 38 : index
    %8 = vector.load %arg4[%c0_8, %c38] : memref<4x512xbf16, #tpu.memory_space<vmem>>, vector<4x16xbf16>
    tpu.vector_store %arg4[%c0_8, %c38], %7 {strides = array<i32>} : memref<4x512xbf16, #tpu.memory_space<vmem>>, vector<4x16xbf16>,
    %9 = vector.extract_strided_slice %5 {offsets = [0, 0, 1, 0], sizes = [1, 4, 1, 16], strides = [1, 1, 1, 1]} : vector<1x4x16x16xbf16> to vector<1x4x1x16xbf16>
    %10 = vector.shape_cast %9 : vector<1x4x1x16xbf16> to vector<4x16xbf16>
    %c0_9 = arith.constant 0 : index
    %c56 = arith.constant 56 : index
    %11 = vector.load %arg4[%c0_9, %c56] : memref<4x512xbf16, #tpu.memory_space<vmem>>, vector<4x16xbf16>
    tpu.vector_store %arg4[%c0_9, %c56], %10 {strides = array<i32>} : memref<4x512xbf16, #tpu.memory_space<vmem>>, vector<4x16xbf16>,
    %12 = vector.extract_strided_slice %5 {offsets = [0, 0, 2, 0], sizes = [1, 4, 1, 16], strides = [1, 1, 1, 1]} : vector<1x4x16x16xbf16> to vector<1x4x1x16xbf16>
    %13 = vector.shape_cast %12 : vector<1x4x1x16xbf16> to vector<4x16xbf16>
    %c0_10 = arith.constant 0 : index
    %c74 = arith.constant 74 : index
    %14 = vector.load %arg4[%c0_10, %c74] : memref<4x512xbf16, #tpu.memory_space<vmem>>, vector<4x16xbf16>
    tpu.vector_store %arg4[%c0_10, %c74], %13 {strides = array<i32>} : memref<4x512xbf16, #tpu.memory_space<vmem>>, vector<4x16xbf16>,
    %15 = vector.extract_strided_slice %5 {offsets = [0, 0, 3, 0], sizes = [1, 4, 1, 16], strides = [1, 1, 1, 1]} : vector<1x4x16x16xbf16> to vector<1x4x1x16xbf16>
    %16 = vector.shape_cast %15 : vector<1x4x1x16xbf16> to vector<4x16xbf16>
    %c0_11 = arith.constant 0 : index
    %c92 = arith.constant 92 : index
    %17 = vector.load %arg4[%c0_11, %c92] : memref<4x512xbf16, #tpu.memory_space<vmem>>, vector<4x16xbf16>
    tpu.vector_store %arg4[%c0_11, %c92], %16 {strides = array<i32>} : memref<4x512xbf16, #tpu.memory_space<vmem>>, vector<4x16xbf16>,
    %18 = vector.extract_strided_slice %5 {offsets = [0, 0, 4, 0], sizes = [1, 4, 1, 16], strides = [1, 1, 1, 1]} : vector<1x4x16x16xbf16> to vector<1x4x1x16xbf16>
    %19 = vector.shape_cast %18 : vector<1x4x1x16xbf16> to vector<4x16xbf16>
    %c0_12 = arith.constant 0 : index
    %c110 = arith.constant 110 : index
    %20 = vector.load %arg4[%c0_12, %c110] : memref<4x512xbf16, #tpu.memory_space<vmem>>, vector<4x16xbf16>
    tpu.vector_store %arg4[%c0_12, %c110], %19 {strides = array<i32>} : memref<4x512xbf16, #tpu.memory_space<vmem>>, vector<4x16xbf16>,
    %21 = vector.extract_strided_slice %5 {offsets = [0, 0, 5, 0], sizes = [1, 4, 1, 16], strides = [1, 1, 1, 1]} : vector<1x4x16x16xbf16> to vector<1x4x1x16xbf16>
    %22 = vector.shape_cast %21 : vector<1x4x1x16xbf16> to vector<4x16xbf16>
    %c0_13 = arith.constant 0 : index
    %c128 = arith.constant 128 : index
    %23 = vector.load %arg4[%c0_13, %c128] : memref<4x512xbf16, #tpu.memory_space<vmem>>, vector<4x16xbf16>
    tpu.vector_store %arg4[%c0_13, %c128], %22 {strides = array<i32>} : memref<4x512xbf16, #tpu.memory_space<vmem>>, vector<4x16xbf16>,
    %24 = vector.extract_strided_slice %5 {offsets = [0, 0, 6, 0], sizes = [1, 4, 1, 16], strides = [1, 1, 1, 1]} : vector<1x4x16x16xbf16> to vector<1x4x1x16xbf16>
    %25 = vector.shape_cast %24 : vector<1x4x1x16xbf16> to vector<4x16xbf16>
    %c0_14 = arith.constant 0 : index
    %c146 = arith.constant 146 : index
    %26 = vector.load %arg4[%c0_14, %c146] : memref<4x512xbf16, #tpu.memory_space<vmem>>, vector<4x16xbf16>
    tpu.vector_store %arg4[%c0_14, %c146], %25 {strides = array<i32>} : memref<4x512xbf16, #tpu.memory_space<vmem>>, vector<4x16xbf16>,
    %27 = vector.extract_strided_slice %5 {offsets = [0, 0, 7, 0], sizes = [1, 4, 1, 16], strides = [1, 1, 1, 1]} : vector<1x4x16x16xbf16> to vector<1x4x1x16xbf16>
    %28 = vector.shape_cast %27 : vector<1x4x1x16xbf16> to vector<4x16xbf16>
    %c0_15 = arith.constant 0 : index
    %c164 = arith.constant 164 : index
    %29 = vector.load %arg4[%c0_15, %c164] : memref<4x512xbf16, #tpu.memory_space<vmem>>, vector<4x16xbf16>
    tpu.vector_store %arg4[%c0_15, %c164], %28 {strides = array<i32>} : memref<4x512xbf16, #tpu.memory_space<vmem>>, vector<4x16xbf16>,
    %30 = vector.extract_strided_slice %5 {offsets = [0, 0, 8, 0], sizes = [1, 4, 1, 16], strides = [1, 1, 1, 1]} : vector<1x4x16x16xbf16> to vector<1x4x1x16xbf16>
    %31 = vector.shape_cast %30 : vector<1x4x1x16xbf16> to vector<4x16xbf16>
    %c0_16 = arith.constant 0 : index
    %c182 = arith.constant 182 : index
    %32 = vector.load %arg4[%c0_16, %c182] : memref<4x512xbf16, #tpu.memory_space<vmem>>, vector<4x16xbf16>
    tpu.vector_store %arg4[%c0_16, %c182], %31 {strides = array<i32>} : memref<4x512xbf16, #tpu.memory_space<vmem>>, vector<4x16xbf16>,
    %33 = vector.extract_strided_slice %5 {offsets = [0, 0, 9, 0], sizes = [1, 4, 1, 16], strides = [1, 1, 1, 1]} : vector<1x4x16x16xbf16> to vector<1x4x1x16xbf16>
    %34 = vector.shape_cast %33 : vector<1x4x1x16xbf16> to vector<4x16xbf16>
    %c0_17 = arith.constant 0 : index
    %c200 = arith.constant 200 : index
    %35 = vector.load %arg4[%c0_17, %c200] : memref<4x512xbf16, #tpu.memory_space<vmem>>, vector<4x16xbf16>
    tpu.vector_store %arg4[%c0_17, %c200], %34 {strides = array<i32>} : memref<4x512xbf16, #tpu.memory_space<vmem>>, vector<4x16xbf16>,
    %36 = vector.extract_strided_slice %5 {offsets = [0, 0, 10, 0], sizes = [1, 4, 1, 16], strides = [1, 1, 1, 1]} : vector<1x4x16x16xbf16> to vector<1x4x1x16xbf16>
    %37 = vector.shape_cast %36 : vector<1x4x1x16xbf16> to vector<4x16xbf16>
    %c0_18 = arith.constant 0 : index
    %c218 = arith.constant 218 : index
    %38 = vector.load %arg4[%c0_18, %c218] : memref<4x512xbf16, #tpu.memory_space<vmem>>, vector<4x16xbf16>
    tpu.vector_store %arg4[%c0_18, %c218], %37 {strides = array<i32>} : memref<4x512xbf16, #tpu.memory_space<vmem>>, vector<4x16xbf16>,
    %39 = vector.extract_strided_slice %5 {offsets = [0, 0, 11, 0], sizes = [1, 4, 1, 16], strides = [1, 1, 1, 1]} : vector<1x4x16x16xbf16> to vector<1x4x1x16xbf16>
    %40 = vector.shape_cast %39 : vector<1x4x1x16xbf16> to vector<4x16xbf16>
    %c0_19 = arith.constant 0 : index
    %c236 = arith.constant 236 : index
    %41 = vector.load %arg4[%c0_19, %c236] : memref<4x512xbf16, #tpu.memory_space<vmem>>, vector<4x16xbf16>
    tpu.vector_store %arg4[%c0_19, %c236], %40 {strides = array<i32>} : memref<4x512xbf16, #tpu.memory_space<vmem>>, vector<4x16xbf16>,
    %42 = vector.extract_strided_slice %5 {offsets = [0, 0, 12, 0], sizes = [1, 4, 1, 16], strides = [1, 1, 1, 1]} : vector<1x4x16x16xbf16> to vector<1x4x1x16xbf16>
    %43 = vector.shape_cast %42 : vector<1x4x1x16xbf16> to vector<4x16xbf16>
    %c0_20 = arith.constant 0 : index
    %c254 = arith.constant 254 : index
    %44 = vector.load %arg4[%c0_20, %c254] : memref<4x512xbf16, #tpu.memory_space<vmem>>, vector<4x16xbf16>
    tpu.vector_store %arg4[%c0_20, %c254], %43 {strides = array<i32>} : memref<4x512xbf16, #tpu.memory_space<vmem>>, vector<4x16xbf16>,
    %45 = vector.extract_strided_slice %5 {offsets = [0, 0, 13, 0], sizes = [1, 4, 1, 16], strides = [1, 1, 1, 1]} : vector<1x4x16x16xbf16> to vector<1x4x1x16xbf16>
    %46 = vector.shape_cast %45 : vector<1x4x1x16xbf16> to vector<4x16xbf16>
    %c0_21 = arith.constant 0 : index
    %c272 = arith.constant 272 : index
    %47 = vector.load %arg4[%c0_21, %c272] : memref<4x512xbf16, #tpu.memory_space<vmem>>, vector<4x16xbf16>
    tpu.vector_store %arg4[%c0_21, %c272], %46 {strides = array<i32>} : memref<4x512xbf16, #tpu.memory_space<vmem>>, vector<4x16xbf16>,
    %48 = vector.extract_strided_slice %5 {offsets = [0, 0, 14, 0], sizes = [1, 4, 1, 16], strides = [1, 1, 1, 1]} : vector<1x4x16x16xbf16> to vector<1x4x1x16xbf16>
    %49 = vector.shape_cast %48 : vector<1x4x1x16xbf16> to vector<4x16xbf16>
    %c0_22 = arith.constant 0 : index
    %c290 = arith.constant 290 : index
    %50 = vector.load %arg4[%c0_22, %c290] : memref<4x512xbf16, #tpu.memory_space<vmem>>, vector<4x16xbf16>
    tpu.vector_store %arg4[%c0_22, %c290], %49 {strides = array<i32>} : memref<4x512xbf16, #tpu.memory_space<vmem>>, vector<4x16xbf16>,
    %51 = vector.extract_strided_slice %5 {offsets = [0, 0, 15, 0], sizes = [1, 4, 1, 16], strides = [1, 1, 1, 1]} : vector<1x4x16x16xbf16> to vector<1x4x1x16xbf16>
    %52 = vector.shape_cast %51 : vector<1x4x1x16xbf16> to vector<4x16xbf16>
    %c0_23 = arith.constant 0 : index
    %c308 = arith.constant 308 : index
    %53 = vector.load %arg4[%c0_23, %c308] : memref<4x512xbf16, #tpu.memory_space<vmem>>, vector<4x16xbf16>
    tpu.vector_store %arg4[%c0_23, %c308], %52 {strides = array<i32>} : memref<4x512xbf16, #tpu.memory_space<vmem>>, vector<4x16xbf16>,
    %c0_24 = arith.constant 0 : index
    %c0_25 = arith.constant 0 : index
    %54 = vector.load %arg4[%c0_24, %c0_25] : memref<4x512xbf16, #tpu.memory_space<vmem>>, vector<4x384xbf16>
    %c0_26 = arith.constant 0 : index
    %c0_27 = arith.constant 0 : index
    %55 = vector.load %arg5[%c0_26, %c0_27] : memref<144x384xbf16, #tpu.memory_space<vmem>>, vector<4x384xbf16>
    tpu.vector_store %arg5[%c0_26, %c0_27], %54 {strides = array<i32>} : memref<144x384xbf16, #tpu.memory_space<vmem>>, vector<4x384xbf16>,
    %c0_28 = arith.constant 0 : index
    %c1 = arith.constant 1 : index
    %56 = vector.load %arg4[%c0_28, %c1] : memref<4x512xbf16, #tpu.memory_space<vmem>>, vector<4x384xbf16>
    %c16 = arith.constant 16 : index
    %c0_29 = arith.constant 0 : index
    %57 = vector.load %arg5[%c16, %c0_29] : memref<144x384xbf16, #tpu.memory_space<vmem>>, vector<4x384xbf16>
    tpu.vector_store %arg5[%c16, %c0_29], %56 {strides = array<i32>} : memref<144x384xbf16, #tpu.memory_space<vmem>>, vector<4x384xbf16>,
    %c0_30 = arith.constant 0 : index
    %c2 = arith.constant 2 : index
    %58 = vector.load %arg4[%c0_30, %c2] : memref<4x512xbf16, #tpu.memory_space<vmem>>, vector<4x384xbf16>
    %c32 = arith.constant 32 : index
    %c0_31 = arith.constant 0 : index
    %59 = vector.load %arg5[%c32, %c0_31] : memref<144x384xbf16, #tpu.memory_space<vmem>>, vector<4x384xbf16>
    tpu.vector_store %arg5[%c32, %c0_31], %58 {strides = array<i32>} : memref<144x384xbf16, #tpu.memory_space<vmem>>, vector<4x384xbf16>,
    %c0_32 = arith.constant 0 : index
    %c18 = arith.constant 18 : index
    %60 = vector.load %arg4[%c0_32, %c18] : memref<4x512xbf16, #tpu.memory_space<vmem>>, vector<4x384xbf16>
    %c48 = arith.constant 48 : index
    %c0_33 = arith.constant 0 : index
    %61 = vector.load %arg5[%c48, %c0_33] : memref<144x384xbf16, #tpu.memory_space<vmem>>, vector<4x384xbf16>
    tpu.vector_store %arg5[%c48, %c0_33], %60 {strides = array<i32>} : memref<144x384xbf16, #tpu.memory_space<vmem>>, vector<4x384xbf16>,
    %c0_34 = arith.constant 0 : index
    %c19 = arith.constant 19 : index
    %62 = vector.load %arg4[%c0_34, %c19] : memref<4x512xbf16, #tpu.memory_space<vmem>>, vector<4x384xbf16>
    %c64 = arith.constant 64 : index
    %c0_35 = arith.constant 0 : index
    %63 = vector.load %arg5[%c64, %c0_35] : memref<144x384xbf16, #tpu.memory_space<vmem>>, vector<4x384xbf16>
    tpu.vector_store %arg5[%c64, %c0_35], %62 {strides = array<i32>} : memref<144x384xbf16, #tpu.memory_space<vmem>>, vector<4x384xbf16>,
    %c0_36 = arith.constant 0 : index
    %c20 = arith.constant 20 : index
    %64 = vector.load %arg4[%c0_36, %c20] : memref<4x512xbf16, #tpu.memory_space<vmem>>, vector<4x384xbf16>
    %c80 = arith.constant 80 : index
    %c0_37 = arith.constant 0 : index
    %65 = vector.load %arg5[%c80, %c0_37] : memref<144x384xbf16, #tpu.memory_space<vmem>>, vector<4x384xbf16>
    tpu.vector_store %arg5[%c80, %c0_37], %64 {strides = array<i32>} : memref<144x384xbf16, #tpu.memory_space<vmem>>, vector<4x384xbf16>,
    %c0_38 = arith.constant 0 : index
    %c36 = arith.constant 36 : index
    %66 = vector.load %arg4[%c0_38, %c36] : memref<4x512xbf16, #tpu.memory_space<vmem>>, vector<4x384xbf16>
    %c96 = arith.constant 96 : index
    %c0_39 = arith.constant 0 : index
    %67 = vector.load %arg5[%c96, %c0_39] : memref<144x384xbf16, #tpu.memory_space<vmem>>, vector<4x384xbf16>
    tpu.vector_store %arg5[%c96, %c0_39], %66 {strides = array<i32>} : memref<144x384xbf16, #tpu.memory_space<vmem>>, vector<4x384xbf16>,
    %c0_40 = arith.constant 0 : index
    %c37 = arith.constant 37 : index
    %68 = vector.load %arg4[%c0_40, %c37] : memref<4x512xbf16, #tpu.memory_space<vmem>>, vector<4x384xbf16>
    %c112 = arith.constant 112 : index
    %c0_41 = arith.constant 0 : index
    %69 = vector.load %arg5[%c112, %c0_41] : memref<144x384xbf16, #tpu.memory_space<vmem>>, vector<4x384xbf16>
    tpu.vector_store %arg5[%c112, %c0_41], %68 {strides = array<i32>} : memref<144x384xbf16, #tpu.memory_space<vmem>>, vector<4x384xbf16>,
    %c0_42 = arith.constant 0 : index
    %c38_43 = arith.constant 38 : index
    %70 = vector.load %arg4[%c0_42, %c38_43] : memref<4x512xbf16, #tpu.memory_space<vmem>>, vector<4x384xbf16>
    %c128_44 = arith.constant 128 : index
    %c0_45 = arith.constant 0 : index
    %71 = vector.load %arg5[%c128_44, %c0_45] : memref<144x384xbf16, #tpu.memory_space<vmem>>, vector<4x384xbf16>
    tpu.vector_store %arg5[%c128_44, %c0_45], %70 {strides = array<i32>} : memref<144x384xbf16, #tpu.memory_space<vmem>>, vector<4x384xbf16>,
    %c0_46 = arith.constant 0 : index
    %c0_47 = arith.constant 0 : index
    %72 = vector.load %arg2[%c0_46, %c0_47] : memref<8x144xbf16, #tpu.memory_space<vmem>>, vector<8x144xbf16>
    %c0_48 = arith.constant 0 : index
    %c0_49 = arith.constant 0 : index
    %73 = vector.load %arg5[%c0_48, %c0_49] : memref<144x384xbf16, #tpu.memory_space<vmem>>, vector<144x384xbf16>
    %cst_50 = arith.constant dense<0.000000e+00> : vector<8x384xf32>
    %74 = tpu.matmul %72, %73, %cst_50 {dimension_numbers = #tpu.dot_dimension_numbers<[1], [0], [0], [1], [0, 0, 1, 1], [], []>} : vector<8x144xbf16>, vector<144x384xbf16>, vector<8x384xf32> -> vector<8x384xf32>
    %75 = arith.truncf %74 : vector<8x384xf32> to vector<8x384xbf16>
    %c0_51 = arith.constant 0 : index
    %c0_52 = arith.constant 0 : index
    %c0_53 = arith.constant 0 : index
    %76 = vector.load %arg3[%c0_51, %c0_52, %c0_53] : memref<1x8x384xbf16, #tpu.memory_space<vmem>>, vector<1x8x384xbf16>
    %77 = vector.shape_cast %76 : vector<1x8x384xbf16> to vector<8x384xbf16>
    %78 = vector.shape_cast %75 : vector<8x384xbf16> to vector<1x8x384xbf16>
    tpu.vector_store %arg3[%c0_51, %c0_52, %c0_53], %78 {strides = array<i32>} : memref<1x8x384xbf16, #tpu.memory_space<vmem>>, vector<1x8x384xbf16>,
    return
  }
  func.func @transform_0(%arg0: i32) -> (i32, i32, i32, i32) {
    %c0_i32 = arith.constant 0 : i32
    %c0_i32_0 = arith.constant 0 : i32
    %c0_i32_1 = arith.constant 0 : i32
    %c0_i32_2 = arith.constant 0 : i32
    return %arg0, %c0_i32, %c0_i32_0, %c0_i32_1 : i32, i32, i32, i32
  }
  func.func @transform_1(%arg0: i32) -> (i32, i32) {
    %c0_i32 = arith.constant 0 : i32
    %c0_i32_0 = arith.constant 0 : i32
    %c0_i32_1 = arith.constant 0 : i32
    return %c0_i32, %c0_i32_0 : i32, i32
  }
  func.func @transform_2(%arg0: i32) -> (i32, i32, i32) {
    %c0_i32 = arith.constant 0 : i32
    %c0_i32_0 = arith.constant 0 : i32
    %c0_i32_1 = arith.constant 0 : i32
    return %arg0, %c0_i32, %c0_i32_0 : i32, i32, i32
  }
}

</mosaic_0001>

<bundles_post_ra>
// kernel: upsample_forward.1
= control target key start
LH: loop header
LB: loop body
LE: loop exit
PB: predicated region body
PF: predicated region fallthrough
CT: control target
= control target key end

     0   :  { %s1303_s9 = smov 0   ;;  %s1673_s0 = inlined_call_operand.vmem [shape: f32[2,4,16,16], index: 0, kind: input, shape index: {}]   ;;  %s1674_s1 = inlined_call_operand.vmem [shape: bf16[8,144], index: 1, kind: input, shape index: {}]   ;;  %s1675_s2 = inlined_call_operand.vmem [shape: bf16[2,8,384], index: 2, kind: output, shape index: {}]  }
   0x1 LB: > { %s1203_s10 = sadd.s32 4294967295, %s1266_s9   ;;  %p1207_p0 = scmp.ge.s32.totalorder %s1266_s9, 1  ;;  %s1266_s9 = sphi %s1303_s9, %s12_s9  }
   0x2   : > { %p112_p1 = scmp.lt.s32.totalorder %s1266_s9, 3 }
   0x4   : > { %p113_p2 = pnand %p1207_p0, %p112_p1 }
   0x5   : > { %p134_p3 = scmp.lt.s32.totalorder (!%p113_p2), %s1203_s10, 1  ;;  %v192_v0 = vlaneseq (!%p113_p2)  ;;  %v1268_v1 = vmov (!%p113_p2), 1983009808   ;;  %v1269_v4 = vmov (!%p113_p2), 0   ;;  %vm250_vm0 = vcmask (!%p113_p2), 1041409   ;;  %s1270_s15 = smov (!%p113_p2), 38  }
   0x6   : > { %116 = sbr.rel (%p113_p2) target bundleno = 600 (0x258), region = 28  ;;  %v190_v2 = vunpack.c.l.s4 (!%p113_p2), %v1268_v1  ;;  %145 = vst [vmem:[#allocation2] sm:$0xff] (!%p113_p2), %v1269_v4  ;;  %146 = vst [vmem:[#allocation3] sm:$0xff] (!%p113_p2), %v1269_v4  ;;  %1093 = vmatprep.subr.bf16.mxu1 (!%p113_p2), %v1269_v4  ;;  %vm253_vm1 = vcmask (!%p113_p2), 1042434   ;;  %vm256_vm2 = vcmask (!%p113_p2), 1043459   ;;  %s1271_s16 = smov (!%p113_p2), 54  }
   0x7   : > { %v193_v3 = vshrl.u32 (!%p113_p2), %v192_v0, 7  ;;  %147 = vst [vmem:[#allocation3 + $0x8] sm:$0xff] (!%p113_p2), %v1269_v4  ;;  %148 = vst [vmem:[#allocation3 + $0x10] sm:$0xff] (!%p113_p2), %v1269_v4  ;;  %s1272_s17 = smov (!%p113_p2), 56   ;;  %s1273_s18 = smov (!%p113_p2), 72   ;;  %vm398_vm3 = vcmask (!%p113_p2), 123904  }
   0x8   : > { %149 = vst [vmem:[#allocation3 + $0x18] sm:$0xff] (!%p113_p2), %v1269_v4  ;;  %150 = vst [vmem:[#allocation3 + $0x20] sm:$0xff] (!%p113_p2), %v1269_v4  ;;  %v191_v5 = vunpack.c.0.s8 (!%p113_p2), %v190_v2  ;;  %s1274_s19 = smov (!%p113_p2), 90   ;;  %s1275_s20 = smov (!%p113_p2), 18   ;;  %vm269_vm4 = vcmask (!%p113_p2), 435504   ;;  %vm288_vm5 = vcmask (!%p113_p2), 583104  }
   0x9   : > { %151 = vst [vmem:[#allocation3 + $0x28] sm:$0xff] (!%p113_p2), %v1269_v4  ;;  %152 = vst [vmem:[#allocation3 + $0x30] sm:$0xff] (!%p113_p2), %v1269_v4  ;;  %s1276_s21 = smov (!%p113_p2), 108   ;;  %s1277_s22 = smov (!%p113_p2), 36   ;;  %vm417_vm6 = vcmask (!%p113_p2), 271504   ;;  %vm436_vm7 = vcmask (!%p113_p2), 419104  }
   0xa   : > { %153 = vst [vmem:[#allocation3 + $0x38] sm:$0xff] (!%p113_p2), %v1269_v4  ;;  %154 = vst [vmem:[#allocation3 + $0x40] sm:$0xff] (!%p113_p2), %v1269_v4  ;;  %v1346_v9 = vsub.s32 (!%p113_p2), %v191_v5, %v193_v3  ;;  %s1278_s23 = smov (!%p113_p2), 74   ;;  %s1279_s24 = smov (!%p113_p2), 126   ;;  %vm519_vm8 = vcmask (!%p113_p2), 566704   ;;  %vm538_vm9 = vcmask (!%p113_p2), 714304  }
   0xb   : > { %155 = vst [vmem:[#allocation3 + $0x48] sm:$0xff] (!%p113_p2), %v1269_v4  ;;  %156 = vst [vmem:[#allocation3 + $0x50] sm:$0xff] (!%p113_p2), %v1269_v4  ;;  %s1280_s25 = smov (!%p113_p2), 92   ;;  %s1281_s26 = smov (!%p113_p2), 16   ;;  %vm557_vm10 = vcmask (!%p113_p2), 861904   ;;  %vm576_vm11 = vcmask (!%p113_p2), 1009504  }
   0xc   : > { %157 = vst [vmem:[#allocation3 + $0x58] sm:$0xff] (!%p113_p2), %v1269_v4  ;;  %158 = vst [vmem:[#allocation3 + $0x60] sm:$0xff] (!%p113_p2), %v1269_v4  ;;  %s1282_s27 = smov (!%p113_p2), 110   ;;  %s1283_s28 = smov (!%p113_p2), 34   ;;  %vm307_vm12 = vcmask (!%p113_p2), 730704   ;;  %vm634_vm13 = vcmask (!%p113_p2), 1042416  }
   0xd   : > { %s1677_s10 = smov (!%p134_p3, %s1203_s10), 1  ;;  %159 = vst [vmem:[#allocation3 + $0x68] sm:$0xff] %v1269_v4  ;;  %160 = vst [vmem:[#allocation3 + $0x70] sm:$0xff] %v1269_v4  ;;  %s1284_s29 = smov 52   ;;  %vm635_vm14 = vcmask 109570   ;;  %vm631_vm15 = vcmask 1031168  }
   0xe   : > { %161 = vst [vmem:[#allocation3 + $0x78] sm:$0xff] %v1269_v4  ;;  %162 = vst [vmem:[#allocation3 + $0x80] sm:$0xff] %v1269_v4  ;;  %s1225_s11 = sshll.u32 %s1677_s10, 6  ;;  %s1285_s30 = smov 127  }
   0xf   : > { %163 = vst [vmem:[#allocation3 + $0x88] sm:$0xff] %v1269_v4  ;;  %164 = vst [vmem:[#allocation3 + $0x90] sm:$0xff] %v1269_v4  ;;  %s138_s14 = scalar_lea.vmem %s1673_s0, %s1225_s11  ;;  %s1286_s3 = smov 109  }
  0x10   : > { %165 = vst [vmem:[#allocation3 + $0x98] sm:$0xff] %v1269_v4  ;;  %166 = vst [vmem:[#allocation3 + $0xa0] sm:$0xff] %v1269_v4  ;;  %v173_v6 = vld [vmem:[%s138_s14] sm:$0xff]  ;;  %v174_v7 = vld [vmem:[%s138_s14 + $0x8] sm:$0xff]  ;;  %s1287_s4 = smov 91   ;;  %s1228_s7 = smul.u32 12, %s1677_s10 }
  0x11   : > { %167 = vst [vmem:[#allocation3 + $0xa8] sm:$0xff] %v1269_v4  ;;  %168 = vst [vmem:[#allocation3 + $0xb0] sm:$0xff] %v1269_v4  ;;  %v175_v8 = vld [vmem:[%s138_s14 + $0x10] sm:$0xff]  ;;  %v176_v10 = vld [vmem:[%s138_s14 + $0x18] sm:$0xff]  ;;  %v181_v13 = vpack.c.bf16 %v174_v7, %v173_v6  ;;  %v1211_v14 = vpack.c.bf16 %v174_v7, %v174_v7 }
  0x12   : > { %169 = vst [vmem:[#allocation3 + $0xb8] sm:$0xff] %v1269_v4  ;;  %170 = vst [vmem:[#allocation3 + $0xc0] sm:$0xff] %v1269_v4  ;;  %v177_v11 = vld [vmem:[%s138_s14 + $0x20] sm:$0xff]  ;;  %v178_v12 = vld [vmem:[%s138_s14 + $0x28] sm:$0xff]  ;;  %v182_v17 = vpack.c.bf16 %v176_v10, %v175_v8  ;;  %v1212_v19 = vpack.c.bf16 %v176_v10, %v176_v10  ;;  %s143_s12 = scalar_lea.vmem %s1675_s2, %s1228_s7 }
  0x13   : > { %171 = vst [vmem:[#allocation3 + $0xc8] sm:$0xff] %v1269_v4  ;;  %172 = vst [vmem:[#allocation3 + $0xd0] sm:$0xff] %v1269_v4  ;;  %v179_v15 = vld [vmem:[%s138_s14 + $0x30] sm:$0xff]  ;;  %v180_v16 = vld [vmem:[%s138_s14 + $0x38] sm:$0xff]  ;;  %v183_v18 = vpack.c.bf16 %v178_v12, %v177_v11  ;;  %v1213_v20 = vpack.c.bf16 %v178_v12, %v178_v12  ;;  %v195_v22 = vrot.slane %v181_v13, %v1346_v9 }
  0x14   : > { %v184_v21 = vpack.c.bf16 %v180_v16, %v179_v15  ;;  %v1350_v23 = vrot.slane %v1211_v14, %v1346_v9  ;;  %v1214_v24 = vpack.c.bf16 %v180_v16, %v180_v16  ;;  %v202_v25 = vrot.slane %v182_v17, %v1346_v9 }
  0x15   : > { %v1354_v26 = vrot.slane %v183_v18, %v1346_v9  ;;  %v1357_v27 = vrot.slane %v1212_v19, %v1346_v9  ;;  %v1360_v28 = vrot.slane %v1213_v20, %v1346_v9  ;;  %v223_v30 = vrot.slane %v195_v22, %v1346_v9 }
  0x16   : > { %v216_v29 = vrot.slane %v184_v21, %v1346_v9  ;;  %v328_v31 = vcombine.high %v195_v22, %v195_v22  ;;  %v1365_v32 = vrot.slane %v1214_v24, %v1346_v9  ;;  %v230_v33 = vrot.slane %v202_v25, %v1346_v9 }
  0x17   : > { %v237_v34 = vrot.slane %v1354_v26, %v1346_v9  ;;  %v329_v35 = vcombine.high %v202_v25, %v202_v25  ;;  %v476_v36 = vrot.slane %v1350_v23, %v1346_v9  ;;  %v1373_v38 = vunpack.c.l.b16 %v223_v30 }
  0x18   : > { %v244_v37 = vrot.slane %v216_v29, %v1346_v9  ;;  %v331_v39 = vcombine.high %v216_v29, %v216_v29  ;;  %v338_v40 = vrot.slane %v328_v31, %v1346_v9  ;;  %v1376_v41 = vunpack.c.l.b16 %v230_v33 }
  0x19   : > { %v1378_v42 = vunpack.c.l.b16 %v237_v34  ;;  %v483_v43 = vrot.slane %v1357_v27, %v1346_v9  ;;  %v490_v44 = vrot.slane %v1360_v28, %v1346_v9  ;;  %v497_v46 = vrot.slane %v1365_v32, %v1346_v9 }
  0x1a   : > { %v1384_v45 = vunpack.c.l.b16 %v244_v37  ;;  %v1388_v47 = vunpack.c.l.b16 %v476_v36  ;;  %v578_v48 = vcombine.high %v1350_v23, %v1350_v23  ;;  %v249_v49 = vrot.slane %v1376_v41, 7 }
  0x1b   : > { %v252_v50 = vrot.slane %v1378_v42, 6  ;;  %v1394_v51 = vunpack.c.l.b16 %v483_v43  ;;  %v1396_v52 = vunpack.c.l.b16 %v490_v44  ;;  %v1399_v54 = vunpack.c.l.b16 %v497_v46 }
  0x1c   : > { %v255_v53 = vrot.slane %v1384_v45, 5  ;;  %v579_v55 = vcombine.high %v1357_v27, %v1357_v27  ;;  %v580_v56 = vcombine.high %v1360_v28, %v1360_v28  ;;  %v251_v57 = vsel %vm250_vm0, %v249_v49, %v1373_v38 }
  0x1d   : > { %v502_v58 = vrot.slane %v1394_v51, 7  ;;  %v504_v59 = vrot.slane %v1396_v52, 6  ;;  %v581_v60 = vcombine.high %v1365_v32, %v1365_v32  ;;  %v254_v61 = vsel %vm253_vm1, %v252_v50, %v251_v57 }
  0x1e   : > { %v506_v62 = vrot.slane %v1399_v54, 5  ;;  %v271_v63 = vrot.slane %v1373_v38, 1  ;;  %v273_v0 = vrot.slane %v1378_v42, 7  ;;  %v257_v1 = vsel %vm256_vm2, %v255_v53, %v254_v61 }
  0x1f   : > { %v503_v2 = vsel %vm250_vm0, %v502_v58, %v1388_v47  ;;  %v275_v3 = vrot.slane %v1384_v45, 6  ;;  %v521_v5 = vrot.slane %v1388_v47, 1  ;;  %v258_v6 = vpack.c.b16 %v257_v1, %v257_v1 }
  0x20   : > { %v505_v7 = vsel %vm253_vm1, %v504_v59, %v503_v2  ;;  %v272_v8 = vsel %vm250_vm0, %v1376_v41, %v271_v63  ;;  %v523_v10 = vrot.slane %v1396_v52, 7  ;;  %v525_v14 = vrot.slane %v1399_v54, 6 }
  0x21   : > { %v507_v11 = vsel %vm256_vm2, %v506_v62, %v505_v7  ;;  %v274_v12 = vsel %vm253_vm1, %v273_v0, %v272_v8  ;;  %v522_v13 = vsel %vm250_vm0, %v1394_v51, %v521_v5  ;;  %v265_v15 = vrot.slane %v258_v6, %v1346_v9 }
  0x22   : > { %v508_v16 = vpack.c.b16 %v507_v11, %v507_v11  ;;  %v276_v17 = vsel %vm256_vm2, %v275_v3, %v274_v12  ;;  %v524_v18 = vsel %vm253_vm1, %v523_v10, %v522_v13  ;;  %v330_v21 = vcombine.high %v1354_v26, %v1354_v26 }
  0x23   : > { %v277_v19 = vpack.c.b16 %v276_v17, %v276_v17  ;;  %v526_v20 = vsel %vm256_vm2, %v525_v14, %v524_v18  ;;  %v345_v22 = vrot.slane %v329_v35, %v1346_v9  ;;  %266 = vrot.lane.b32.xlu0 %v265_v15, %s1270_s15  ;;  %v359_v29 = vrot.slane %v331_v39, %v1346_v9 }
  0x24   : > { %v515_v24 = vrot.slane %v508_v16, %v1346_v9  ;;  %v527_v25 = vpack.c.b16 %v526_v20, %v526_v20  ;;  %v1438_v30 = vunpack.c.l.b16 %v338_v40  ;;  %v352_v33 = vrot.slane %v330_v21, %v1346_v9 }
  0x25   : > { %v284_v31 = vrot.slane %v277_v19, %v1346_v9  ;;  %v1442_v34 = vunpack.c.l.b16 %v345_v22  ;;  %v540_v36 = vrot.slane %v1388_v47, 2  ;;  %v1446_v35 = vunpack.c.l.b16 %v359_v29 }
  0x26   : > { %516 = vrot.lane.b32.xlu1 %v515_v24, %s1271_s16  ;;  %v534_v26 = vrot.slane %v527_v25, %v1346_v9  ;;  %v400_v37 = vrot.slane %v1438_v30, 2  ;;  %v541_v39 = vrot.slane %v1394_v51, 1  ;;  %v1450_v40 = vunpack.c.l.b16 %v352_v33 }
  0x27   : > { %v401_v43 = vrot.slane %v1442_v34, 1  ;;  %v544_v44 = vrot.slane %v1399_v54, 7  ;;  %v419_v46 = vrot.slane %v1438_v30, 3  ;;  %285 = vrot.lane.b32.xlu0 %v284_v31, %s1272_s17  ;;  %v404_v49 = vrot.slane %v1446_v35, 7 }
  0x28   : > { %v542_v50 = vsel %vm250_vm0, %v541_v39, %v540_v36  ;;  %v420_v53 = vrot.slane %v1442_v34, 2  ;;  %v559_v57 = vrot.slane %v1388_v47, 3  ;;  %v422_v61 = vrot.slane %v1450_v40, 1 }
  0x29   : > { %v402_v58 = vsel %vm250_vm0, %v401_v43, %v400_v37  ;;  %v543_v59 = vsel %vm253_vm1, %v1396_v52, %v542_v50  ;;  %v560_v62 = vrot.slane %v1394_v51, 2  ;;  %v562_v47 = vrot.slane %v1396_v52, 1 }
  0x2a   : > { %535 = vrot.lane.b32.xlu1 %v534_v26, %s1273_s18  ;;  %v403_v63 = vsel %vm253_vm1, %v1450_v40, %v402_v58  ;;  %v545_v0 = vsel %vm256_vm2, %v544_v44, %v543_v59  ;;  %v421_v1 = vsel %vm250_vm0, %v420_v53, %v419_v46  ;;  %v588_v10 = vrot.slane %v578_v48, %v1346_v9 }
  0x2b   : > { %v405_v2 = vsel %vm256_vm2, %v404_v49, %v403_v63  ;;  %v546_v3 = vpack.c.b16 %v545_v0, %v545_v0  ;;  %v423_v5 = vsel %vm253_vm1, %v422_v61, %v421_v1  ;;  %v561_v6 = vsel %vm250_vm0, %v560_v62, %v559_v57 }
  0x2c   : > { %v406_v7 = vpack.c.b16 %v405_v2, %v405_v2  ;;  %v424_v51 = vsel %vm256_vm2, %v1446_v35, %v423_v5  ;;  %v563_v8 = vsel %vm253_vm1, %v562_v47, %v561_v6  ;;  %v595_v13 = vrot.slane %v579_v55, %v1346_v9 }
  0x2d   : > { %v553_v52 = vrot.slane %v546_v3, %v1346_v9  ;;  %v425_v11 = vpack.c.b16 %v424_v51, %v424_v51  ;;  %v564_v12 = vsel %vm256_vm2, %v1399_v54, %v563_v8  ;;  %v602_v23 = vrot.slane %v580_v56, %v1346_v9 }
  0x2e   : > { %v413_v14 = vrot.slane %v406_v7, %v1346_v9  ;;  %v565_v15 = vpack.c.b16 %v564_v12, %v564_v12  ;;  %v609_v48 = vrot.slane %v581_v60, %v1346_v9  ;;  %v1497_v27 = vunpack.c.l.b16 %v588_v10 }
  0x2f   : > { %554 = vrot.lane.b32.xlu1 %v553_v52, %s1274_s19  ;;  %v432_v54 = vrot.slane %v425_v11, %v1346_v9  ;;  %v1499_v55 = vunpack.c.l.b16 %v595_v13  ;;  %v290_v16 = vrot.slane %v1373_v38, 2  ;;  %v1503_v56 = vunpack.c.l.b16 %v602_v23 }
  0x30   : > { %414 = vrot.lane.b32.xlu0 %v413_v14, %s1275_s20  ;;  %v572_v28 = vrot.slane %v565_v15, %v1346_v9  ;;  %v1505_v17 = vunpack.c.l.b16 %v609_v48  ;;  %v291_v32 = vrot.slane %v1376_v41, 1  ;;  %v294_v18 = vrot.slane %v1384_v45, 7 }
  0x31   : > { %v614_v60 = vrot.slane %v1499_v55, 7  ;;  %v638_v19 = vrot.slane %v1497_v27, 1  ;;  %v309_v20 = vrot.slane %v1373_v38, 3  ;;  %v616_v21 = vrot.slane %v1503_v56, 6 }
  0x32   : > { %v618_v22 = vrot.slane %v1505_v17, 5  ;;  %v292_v24 = vsel %vm250_vm0, %v291_v32, %v290_v16  ;;  %v640_v25 = vrot.slane %v1503_v56, 7  ;;  %v642_v33 = vrot.slane %v1505_v17, 6 }
  0x33   : > { %573 = vrot.lane.b32.xlu1 %v572_v28, %s1276_s21  ;;  %v615_v29 = vsel %vm250_vm0, %v614_v60, %v1497_v27  ;;  %v293_v31 = vsel %vm253_vm1, %v1378_v42, %v292_v24  ;;  %v639_v38 = vsel %vm250_vm0, %v1499_v55, %v638_v19  ;;  %v310_v39 = vrot.slane %v1376_v41, 2 }
  0x34   : > { %433 = vrot.lane.b32.xlu0 %v432_v54, %s1277_s22  ;;  %v617_v36 = vsel %vm253_vm1, %v616_v21, %v615_v29  ;;  %v295_v26 = vsel %vm256_vm2, %v294_v18, %v293_v31  ;;  %v641_v37 = vsel %vm253_vm1, %v640_v25, %v639_v38  ;;  %v312_v49 = vrot.slane %v1378_v42, 1 }
  0x35   : > { %v619_v43 = vsel %vm256_vm2, %v618_v22, %v617_v36  ;;  %v296_v44 = vpack.c.b16 %v295_v26, %v295_v26  ;;  %v643_v46 = vsel %vm256_vm2, %v642_v33, %v641_v37  ;;  %v311_v57 = vsel %vm250_vm0, %v310_v39, %v309_v20 }
  0x36   : > { %v620_v50 = vpack.c.b16 %v619_v43, %v619_v43  ;;  %v644_v53 = vpack.c.b16 %v643_v46, %v643_v46  ;;  %v657_v58 = vrot.slane %v1497_v27, 2  ;;  %v313_v61 = vsel %vm253_vm1, %v312_v49, %v311_v57 }
  0x37   : > { %v303_v59 = vrot.slane %v296_v44, %v1346_v9  ;;  %v658_v62 = vrot.slane %v1499_v55, 1  ;;  %v661_v41 = vrot.slane %v1505_v17, 7  ;;  %v314_v42 = vsel %vm256_vm2, %v1384_v45, %v313_v61 }
  0x38   : > { %v627_v63 = vrot.slane %v620_v50, %v1346_v9  ;;  %v651_v0 = vrot.slane %v644_v53, %v1346_v9  ;;  %v364_v1 = vrot.slane %v1442_v34, 7  ;;  %v315_v47 = vpack.c.b16 %v314_v42, %v314_v42 }
  0x39   : > { %304 = vrot.lane.b32.xlu1 %v303_v59, %s1278_s23  ;;  %v659_v2 = vsel %vm250_vm0, %v658_v62, %v657_v58  ;;  %v366_v3 = vrot.slane %v1450_v40, 6  ;;  %v368_v5 = vrot.slane %v1446_v35, 5  ;;  %v676_v7 = vrot.slane %v1497_v27, 3 }
  0x3a   : > { %628 = vrot.lane.b32.xlu0 %v627_v63, %s1279_s24  ;;  %v660_v6 = vsel %vm253_vm1, %v1503_v56, %v659_v2  ;;  %v365_v45 = vsel %vm250_vm0, %v364_v1, %v1438_v30  ;;  %v677_v51 = vrot.slane %v1499_v55, 2  ;;  %v322_v8 = vrot.slane %v315_v47, %v1346_v9 }
  0x3b   : > { %v662_v10 = vsel %vm256_vm2, %v661_v41, %v660_v6  ;;  %v367_v52 = vsel %vm253_vm1, %v366_v3, %v365_v45  ;;  %v679_v11 = vrot.slane %v1503_v56, 1  ;;  %v383_v48 = vrot.slane %v1438_v30, 1 }
  0x3c   : > { %v663_v12 = vpack.c.b16 %v662_v10, %v662_v10  ;;  %v369_v13 = vsel %vm256_vm2, %v368_v5, %v367_v52  ;;  %v678_v14 = vsel %vm250_vm0, %v677_v51, %v676_v7  ;;  %v385_v54 = vrot.slane %v1450_v40, 7 }
  0x3d   : > { %323 = vrot.lane.b32.xlu1 %v322_v8, %s1280_s25  ;;  %v370_v15 = vpack.c.b16 %v369_v13, %v369_v13  ;;  %v680_v23 = vsel %vm253_vm1, %v679_v11, %v678_v14  ;;  %v387_v16 = vrot.slane %v1446_v35, 6  ;;  %v384_v32 = vsel %vm250_vm0, %v1442_v34, %v383_v48  ;;  %vm636_vm0 = vmor %vm635_vm14, %vm634_vm13 }
  0x3e   : > { %652 = vrot.lane.b32.xlu0 %v651_v0, %s1281_s26  ;;  %v670_v27 = vrot.slane %v663_v12, %v1346_v9  ;;  %v681_v55 = vsel %vm256_vm2, %v1505_v17, %v680_v23  ;;  %v386_v60 = vsel %vm253_vm1, %v385_v54, %v384_v32  ;;  %vm326_vm1 = vcmask 878304   ;;  %v1603_v0 = vld [vmem:[%s1674_s1] sm:$0xff] }
  0x3f   : > { %v377_v28 = vrot.slane %v370_v15, %v1346_v9  ;;  %v682_v56 = vpack.c.b16 %v681_v55, %v681_v55  ;;  %v388_v30 = vsel %vm256_vm2, %v387_v16, %v386_v60  ;;  %vm655_vm2 = vcmask 255104  }
  0x40   : > { %v389_v17 = vpack.c.b16 %v388_v30, %v388_v30  ;;  %v1218_v42 = vcombine.high %v1603_v0, %v1603_v0  ;;  %vm1004_vm13 = vcmask 736256  }
  0x41   : > { %378 = vrot.lane.b32.xlu1 %v377_v28, %s1282_s27  ;;  %v689_v40 = vrot.slane %v682_v56, %v1346_v9 }
  0x42   : > { %671 = vrot.lane.b32.xlu0 %v670_v27, %s1283_s28  ;;  %v396_v35 = vrot.slane %v389_v17, %v1346_v9 }
  0x44   : > { %399 = vst.msk [vmem:[#allocation2 + $0x2] sm:$0x3] %vm398_vm3, %v396_v35  ;;  %vm381_vm3 = vcmask 1025904  }
  0x46   : > { %690 = vrot.lane.b32.xlu0 %v689_v40, %s1284_s29 }
  0x95   : > { %v267_v34 = vpop.permute.xlu0 %266 }
  0x96   : > { %270 = vst.msk [vmem:[#allocation2] sm:$0x3] %vm269_vm4, %v267_v34  ;;  %vm674_vm4 = vcmask 402704  }
  0x98   : > { %v517_v18 = vpop.permute.xlu1 %516 }
  0x99   : > { %v286_v19 = vpop.permute.xlu0 %285 }
  0x9a   : > { %289 = vst.msk [vmem:[#allocation2] sm:$0x3] %vm288_vm5, %v286_v19  ;;  %vm693_vm5 = vcmask 550304  }
  0x9c   : > { %v536_v20 = vpop.permute.xlu1 %535 }
  0xa1   : > { %v555_v21 = vpop.permute.xlu1 %554 }
  0xa2   : > { %v415_v22 = vpop.permute.xlu0 %414 }
  0xa3   : > { %418 = vst.msk [vmem:[#allocation2 + $0x2] sm:$0x3] %vm417_vm6, %v415_v22  ;;  %vm1048_vm6 = vcmask 130048  }
  0xa4   : > { %1219 = vmatprep.mubr.msk.bf16.mxu0 %vm1048_vm6, %v1218_v42  ;;  %1220 = vmatprep.mubr.msk.bf16.mxu1 %vm1048_vm6, %v1218_v42 }
  0xa5   : > { %v574_v24 = vpop.permute.xlu1 %573 }
  0xa6   : > { %v434_v25 = vpop.permute.xlu0 %433 }
  0xa7   : > { %437 = vst.msk [vmem:[#allocation2 + $0x2] sm:$0x3] %vm436_vm7, %v434_v25  ;;  %vm746_vm7 = vcmask 1039360  }
  0xa8   : > { %520 = vst.msk [vmem:[#allocation2 + $0x2] sm:$0x3] %vm519_vm8, %v517_v18  ;;  %vm819_vm8 = vcmask 900096  }
  0xa9   : > { %539 = vst.msk [vmem:[#allocation2 + $0x2] sm:$0x3] %vm538_vm9, %v536_v20  ;;  %vm856_vm9 = vcmask 891904  }
  0xaa   : > { %558 = vst.msk [vmem:[#allocation2 + $0x2] sm:$0x3] %vm557_vm10, %v555_v21  ;;  %vm893_vm10 = vcmask 883712  }
  0xab   : > { %577 = vst.msk [vmem:[#allocation2 + $0x2] sm:$0x3] %vm576_vm11, %v574_v24  ;;  %v305_v29 = vpop.permute.xlu1 %304  ;;  %vm930_vm11 = vcmask 752640  }
  0xac   : > { %v629_v31 = vpop.permute.xlu0 %628  ;;  %308 = vst.msk [vmem:[#allocation2] sm:$0x3] %vm307_vm12, %v305_v29  ;;  %vm967_vm12 = vcmask 744448  }
  0xad   : > { %v630_v38 = vrot.slane %v629_v31, 6 }
  0xaf   : > { %v632_v33 = vsel %vm631_vm15, %v630_v38, %v629_v31  ;;  %v324_v36 = vpop.permute.xlu1 %323 }
  0xb0   : > { %637 = vst.msk [vmem:[#allocation2 + $0x2] sm:$0xf] %vm636_vm0, %v632_v33  ;;  %v653_v26 = vpop.permute.xlu0 %652 }
  0xb1   : > { %327 = vst.msk [vmem:[#allocation2] sm:$0x3] %vm326_vm1, %v324_v36 }
  0xb2   : > { %656 = vst.msk [vmem:[#allocation2 + $0x4] sm:$0x3] %vm655_vm2, %v653_v26 }
  0xb3   : > { %v379_v37 = vpop.permute.xlu1 %378 }
  0xb4   : > { %v672_v39 = vpop.permute.xlu0 %671  ;;  %382 = vst.msk [vmem:[#allocation2] sm:$0x3] %vm381_vm3, %v379_v37 }
  0xb5   : > { %675 = vst.msk [vmem:[#allocation2 + $0x4] sm:$0x3] %vm674_vm4, %v672_v39 }
  0xb8   : > { %v691_v43 = vpop.permute.xlu0 %690 }
  0xb9   : > { %694 = vst.msk [vmem:[#allocation2 + $0x4] sm:$0x3] %vm693_vm5, %v691_v43 }
  0xc0   : > { %v695_v44 = vld [vmem:[#allocation2] sm:$0x3f] }
  0xc1   : > { %v719_v46 = vld [vmem:[#allocation2] sm:$0xff]  ;;  %1215 = vst.sshfl [vmem:[#allocation3] sm:$0x3 pattern:$0x76325410] %v695_v44  ;;  %v697_v53 = vcombine.high %v695_v44, %v695_v44  ;;  %v704_v57 = vrot.slane %v695_v44, %v1346_v9 }
  0xc2   : > { %v728_v49 = vrot.slane %v719_v46, %v1346_v9  ;;  %v721_v50 = vcombine.high %v719_v46, %v719_v46 }
  0xc3   : > { %1216 = vst.sshfl [vmem:[#allocation3 + $0x10] sm:$0x3 pattern:$0x76325410] %v697_v53  ;;  %v712_v59 = vcombine.high %v704_v57, %v704_v57 }
  0xc4   : > { %738 = vrot.lane.b32.xlu1 %v728_v49, %s1285_s30  ;;  %v735_v58 = vrot.slane %v721_v50, %v1346_v9  ;;  %v736_v41 = vcombine.high %v728_v49, %v728_v49 }
  0xc5   : > { %717 = vst [vmem:[#allocation3 + $0x8] sm:$0x3] %v712_v59 }
  0xc6   : > { %742 = vrot.lane.b32.xlu0 %v735_v58, %s1285_s30  ;;  %v737_v63 = vcombine.high %v735_v58, %v735_v58 }
  0xc8   : > { %775 = vrot.lane.b32.xlu1 %v728_v49, %s1279_s24  ;;  %v1015_v9 = vld [vmem:[#allocation3] sm:$0xff] }
  0xca   : > { %779 = vrot.lane.b32.xlu0 %v735_v58, %s1279_s24  ;;  %v1017_v61 = vld [vmem:[#allocation3 + $0x10] sm:$0xff] }
  0xcb   : > { %1094 = vmatpush1.bf16.msra.mxu1 %v1017_v61 }
  0xcc   : > { %811 = vrot.lane.b32.xlu1 %v728_v49, %s1282_s27  ;;  %v1016_v62 = vld [vmem:[#allocation3 + $0x8] sm:$0xff]  ;;  %1095 = vmatprep.subr.bf16.mxu1 %v1269_v4 }
  0xcd   : > { %1052 = vmatprep.subr.bf16.mxu0 %v1016_v62 }
  0xce   : > { %815 = vrot.lane.b32.xlu0 %v735_v58, %s1282_s27  ;;  %1053 = vmatpush1.bf16.msra.mxu0 %v1015_v9 }
  0xd0   : > { %848 = vrot.lane.b32.xlu1 %v728_v49, %s1286_s3 }
  0xd2   : > { %852 = vrot.lane.b32.xlu0 %v735_v58, %s1286_s3 }
  0xd4   : > { %885 = vrot.lane.b32.xlu1 %v728_v49, %s1276_s21 }
  0xd6   : > { %889 = vrot.lane.b32.xlu0 %v735_v58, %s1276_s21 }
  0xd8   : > { %922 = vrot.lane.b32.xlu1 %v728_v49, %s1280_s25 }
  0xda   : > { %926 = vrot.lane.b32.xlu0 %v735_v58, %s1280_s25 }
  0xdc   : > { %959 = vrot.lane.b32.xlu1 %v728_v49, %s1287_s4 }
  0xde   : > { %963 = vrot.lane.b32.xlu0 %v735_v58, %s1287_s4 }
  0xe0   : > { %740 = vrot.lane.b32.xlu1 %v736_v41, %s1285_s30 }
  0xe2   : > { %1000 = vrot.lane.b32.xlu0 %v735_v58, %s1274_s19 }
  0xe4   : > { %777 = vrot.lane.b32.xlu1 %v736_v41, %s1279_s24 }
  0xe6   : > { %744 = vrot.lane.b32.xlu0 %v737_v63, %s1285_s30 }
  0xe8   : > { %813 = vrot.lane.b32.xlu1 %v736_v41, %s1282_s27 }
  0xea   : > { %781 = vrot.lane.b32.xlu0 %v737_v63, %s1279_s24 }
  0xec   : > { %850 = vrot.lane.b32.xlu1 %v736_v41, %s1286_s3 }
  0xee   : > { %817 = vrot.lane.b32.xlu0 %v737_v63, %s1282_s27 }
  0xf0   : > { %887 = vrot.lane.b32.xlu1 %v736_v41, %s1276_s21 }
  0xf2   : > { %854 = vrot.lane.b32.xlu0 %v737_v63, %s1286_s3 }
  0xf4   : > { %924 = vrot.lane.b32.xlu1 %v736_v41, %s1280_s25 }
  0xf6   : > { %891 = vrot.lane.b32.xlu0 %v737_v63, %s1276_s21 }
  0xf8   : > { %961 = vrot.lane.b32.xlu1 %v736_v41, %s1287_s4 }
  0xfa   : > { %928 = vrot.lane.b32.xlu0 %v737_v63, %s1280_s25 }
  0xfc   : > { %998 = vrot.lane.b32.xlu1 %v736_v41, %s1274_s19 }
  0xfe   : > { %965 = vrot.lane.b32.xlu0 %v737_v63, %s1287_s4 }
 0x100   : > { %996 = vrot.lane.b32.xlu1 %v728_v49, %s1274_s19 }
 0x102   : > { %1002 = vrot.lane.b32.xlu0 %v737_v63, %s1274_s19 }
 0x136   : > { %v739_v1 = vpop.permute.xlu1 %738 }
 0x138   : > { %v743_v47 = vpop.permute.xlu0 %742 }
 0x13a   : > { %v776_v2 = vpop.permute.xlu1 %775 }
 0x13c   : > { %v780_v3 = vpop.permute.xlu0 %779 }
 0x13e   : > { %v812_v5 = vpop.permute.xlu1 %811 }
 0x140   : > { %v816_v6 = vpop.permute.xlu0 %815 }
 0x142   : > { %v849_v45 = vpop.permute.xlu1 %848 }
 0x144   : > { %v1610_v7 = vpop.permute.xlu0 %852 }
 0x146   : > { %v886_v51 = vpop.permute.xlu1 %885 }
 0x148   : > { %v1612_v8 = vpop.permute.xlu0 %889 }
 0x14a   : > { %v1614_v10 = vpop.permute.xlu1 %922 }
 0x14c   : > { %v1616_v52 = vpop.permute.xlu0 %926 }
 0x14e   : > { %v1618_v11 = vpop.permute.xlu1 %959 }
 0x150   : > { %v1620_v12 = vpop.permute.xlu0 %963 }
 0x152   : > { %v741_v13 = vpop.permute.xlu1 %740 }
 0x153   : > { %v747_v14 = vsel %vm746_vm7, %v739_v1, %v741_v13  ;;  %v748_v15 = vsel %vm746_vm7, %v741_v13, %v743_v47 }
 0x154   : > { %753 = vst [vmem:[#allocation3 + $0x18] sm:$0x3] %v747_v14  ;;  %754 = vst [vmem:[#allocation3 + $0x20] sm:$0x3] %v748_v15  ;;  %v1622_v23 = vpop.permute.xlu0 %1000 }
 0x156   : > { %v778_v48 = vpop.permute.xlu1 %777 }
 0x157   : > { %v783_v54 = vsel %vm631_vm15, %v776_v2, %v778_v48  ;;  %v784_v27 = vsel %vm631_vm15, %v778_v48, %v780_v3  ;;  %v1217_v48 = vcombine.low %v1603_v0, %v1603_v0 }
 0x158   : > { %789 = vst [vmem:[#allocation3 + $0x30] sm:$0x3] %v783_v54  ;;  %790 = vst [vmem:[#allocation3 + $0x38] sm:$0x3] %v784_v27  ;;  %v745_v55 = vpop.permute.xlu0 %744 }
 0x159   : > { %v749_v16 = vsel %vm746_vm7, %v743_v47, %v745_v55 }
 0x15a   : > { %755 = vst [vmem:[#allocation3 + $0x28] sm:$0x3] %v749_v16  ;;  %v814_v28 = vpop.permute.xlu1 %813 }
 0x15b   : > { %v820_v56 = vsel %vm819_vm8, %v812_v5, %v814_v28  ;;  %v821_v32 = vsel %vm819_vm8, %v814_v28, %v816_v6  ;;  %v1019_v60 = vld [vmem:[#allocation3 + $0x20] sm:$0xff]  ;;  %v1018_v30 = vld [vmem:[#allocation3 + $0x18] sm:$0xff] }
 0x15c   : > { %826 = vst [vmem:[#allocation3 + $0x48] sm:$0x3] %v820_v56  ;;  %827 = vst [vmem:[#allocation3 + $0x50] sm:$0x3] %v821_v32  ;;  %v782_v40 = vpop.permute.xlu0 %781  ;;  %1054 = vmatprep.subr.bf16.mxu0 %v1019_v60 }
 0x15d   : > { %v785_v17 = vsel %vm631_vm15, %v780_v3, %v782_v40  ;;  %1055 = vmatpush1.bf16.msra.mxu0 %v1018_v30 }
 0x15e   : > { %791 = vst [vmem:[#allocation3 + $0x40] sm:$0x3] %v785_v17  ;;  %v851_v35 = vpop.permute.xlu1 %850 }
 0x15f   : > { %v857_v34 = vsel %vm856_vm9, %v849_v45, %v851_v35  ;;  %v858_v18 = vsel %vm856_vm9, %v851_v35, %v1610_v7  ;;  %v1022_v19 = vld [vmem:[#allocation3 + $0x38] sm:$0xff]  ;;  %v1021_v20 = vld [vmem:[#allocation3 + $0x30] sm:$0xff] }
 0x160   : > { %863 = vst [vmem:[#allocation3 + $0x60] sm:$0x3] %v857_v34  ;;  %864 = vst [vmem:[#allocation3 + $0x68] sm:$0x3] %v858_v18  ;;  %v818_v21 = vpop.permute.xlu0 %817  ;;  %1056 = vmatprep.subr.bf16.mxu0 %v1022_v19 }
 0x161   : > { %v822_v22 = vsel %vm819_vm8, %v816_v6, %v818_v21  ;;  %1057 = vmatpush1.bf16.msra.mxu0 %v1021_v20  ;;  %v1020_v24 = vld [vmem:[#allocation3 + $0x28] sm:$0xff] }
 0x162   : > { %828 = vst [vmem:[#allocation3 + $0x58] sm:$0x3] %v822_v22  ;;  %v888_v25 = vpop.permute.xlu1 %887  ;;  %1096 = vmatpush1.bf16.msra.mxu1 %v1020_v24 }
 0x163   : > { %v894_v29 = vsel %vm893_vm10, %v886_v51, %v888_v25  ;;  %v895_v31 = vsel %vm893_vm10, %v888_v25, %v1612_v8  ;;  %v1025_v38 = vld [vmem:[#allocation3 + $0x50] sm:$0xff]  ;;  %v1024_v33 = vld [vmem:[#allocation3 + $0x48] sm:$0xff]  ;;  %1097 = vmatprep.subr.bf16.mxu1 %v1269_v4 }
 0x164   : > { %900 = vst [vmem:[#allocation3 + $0x78] sm:$0x3] %v894_v29  ;;  %901 = vst [vmem:[#allocation3 + $0x80] sm:$0x3] %v895_v31  ;;  %v855_v36 = vpop.permute.xlu0 %854  ;;  %1058 = vmatprep.subr.bf16.mxu0 %v1025_v38 }
 0x165   : > { %v859_v26 = vsel %vm856_vm9, %v1610_v7, %v855_v36  ;;  %1059 = vmatpush1.bf16.msra.mxu0 %v1024_v33  ;;  %v1023_v37 = vld [vmem:[#allocation3 + $0x40] sm:$0xff] }
 0x166   : > { %865 = vst [vmem:[#allocation3 + $0x70] sm:$0x3] %v859_v26  ;;  %v925_v39 = vpop.permute.xlu1 %924  ;;  %1098 = vmatpush1.bf16.msra.mxu1 %v1023_v37 }
 0x167   : > { %v931_v43 = vsel %vm930_vm11, %v1614_v10, %v925_v39  ;;  %v932_v44 = vsel %vm930_vm11, %v925_v39, %v1616_v52  ;;  %v1028_v46 = vld [vmem:[#allocation3 + $0x68] sm:$0xff]  ;;  %v1027_v49 = vld [vmem:[#allocation3 + $0x60] sm:$0xff]  ;;  %1099 = vmatprep.subr.bf16.mxu1 %v1269_v4 }
 0x168   : > { %937 = vst [vmem:[#allocation3 + $0x90] sm:$0x3] %v931_v43  ;;  %938 = vst [vmem:[#allocation3 + $0x98] sm:$0x3] %v932_v44  ;;  %v892_v50 = vpop.permute.xlu0 %891  ;;  %1060 = vmatprep.subr.bf16.mxu0 %v1028_v46 }
 0x169   : > { %v896_v53 = vsel %vm893_vm10, %v1612_v8, %v892_v50  ;;  %1061 = vmatpush1.bf16.msra.mxu0 %v1027_v49  ;;  %v1026_v57 = vld [vmem:[#allocation3 + $0x58] sm:$0xff] }
 0x16a   : > { %902 = vst [vmem:[#allocation3 + $0x88] sm:$0x3] %v896_v53  ;;  %v962_v58 = vpop.permute.xlu1 %961  ;;  %1100 = vmatpush1.bf16.msra.mxu1 %v1026_v57 }
 0x16b   : > { %v968_v59 = vsel %vm967_vm12, %v1618_v11, %v962_v58  ;;  %v969_v61 = vsel %vm967_vm12, %v962_v58, %v1620_v12  ;;  %v1031_v62 = vld [vmem:[#allocation3 + $0x80] sm:$0xff]  ;;  %v1030_v9 = vld [vmem:[#allocation3 + $0x78] sm:$0xff]  ;;  %1101 = vmatprep.subr.bf16.mxu1 %v1269_v4 }
 0x16c   : > { %974 = vst [vmem:[#allocation3 + $0xa8] sm:$0x3] %v968_v59  ;;  %975 = vst [vmem:[#allocation3 + $0xb0] sm:$0x3] %v969_v61  ;;  %v929_v41 = vpop.permute.xlu0 %928  ;;  %1062 = vmatprep.subr.bf16.mxu0 %v1031_v62 }
 0x16d   : > { %v933_v63 = vsel %vm930_vm11, %v1616_v52, %v929_v41  ;;  %1063 = vmatpush1.bf16.msra.mxu0 %v1030_v9  ;;  %v1029_v42 = vld [vmem:[#allocation3 + $0x70] sm:$0xff] }
 0x16e   : > { %939 = vst [vmem:[#allocation3 + $0xa0] sm:$0x3] %v933_v63  ;;  %v999_v1 = vpop.permute.xlu1 %998  ;;  %1102 = vmatpush1.bf16.msra.mxu1 %v1029_v42 }
 0x16f   : > { %v1006_v47 = vsel %vm1004_vm13, %v999_v1, %v1622_v23  ;;  %v1034_v2 = vld [vmem:[#allocation3 + $0x98] sm:$0xff]  ;;  %v1033_v3 = vld [vmem:[#allocation3 + $0x90] sm:$0xff]  ;;  %1103 = vmatprep.subr.bf16.mxu1 %v1269_v4 }
 0x170   : > { %1012 = vst [vmem:[#allocation3 + $0xc8] sm:$0x3] %v1006_v47  ;;  %v966_v5 = vpop.permute.xlu0 %965  ;;  %1064 = vmatprep.subr.bf16.mxu0 %v1034_v2 }
 0x171   : > { %v970_v6 = vsel %vm967_vm12, %v1620_v12, %v966_v5  ;;  %1065 = vmatpush1.bf16.msra.mxu0 %v1033_v3  ;;  %v1032_v45 = vld [vmem:[#allocation3 + $0x88] sm:$0xff] }
 0x172   : > { %976 = vst [vmem:[#allocation3 + $0xb8] sm:$0x3] %v970_v6  ;;  %v997_v7 = vpop.permute.xlu1 %996  ;;  %1104 = vmatpush1.bf16.msra.mxu1 %v1032_v45 }
 0x173   : > { %v1005_v51 = vsel %vm1004_vm13, %v997_v7, %v999_v1  ;;  %v1037_v8 = vld [vmem:[#allocation3 + $0xb0] sm:$0xff]  ;;  %v1036_v10 = vld [vmem:[#allocation3 + $0xa8] sm:$0xff]  ;;  %1105 = vmatprep.subr.bf16.mxu1 %v1269_v4 }
 0x174   : > { %1011 = vst [vmem:[#allocation3 + $0xc0] sm:$0x3] %v1005_v51  ;;  %v1003_v52 = vpop.permute.xlu0 %1002  ;;  %1066 = vmatprep.subr.bf16.mxu0 %v1037_v8 }
 0x175   : > { %v1007_v11 = vsel %vm1004_vm13, %v1622_v23, %v1003_v52  ;;  %1067 = vmatpush1.bf16.msra.mxu0 %v1036_v10  ;;  %v1035_v13 = vld [vmem:[#allocation3 + $0xa0] sm:$0xff] }
 0x176   : > { %1013 = vst [vmem:[#allocation3 + $0xd0] sm:$0x3] %v1007_v11  ;;  %1106 = vmatpush1.bf16.msra.mxu1 %v1035_v13 }
 0x177   : > { %v1040_v12 = vld [vmem:[#allocation3 + $0xc8] sm:$0xff]  ;;  %1107 = vmatprep.subr.bf16.mxu1 %v1269_v4 }
 0x178   : > { %1068 = vmatprep.subr.bf16.mxu0 %v1040_v12 }
 0x179   : > { %v1038_v14 = vld [vmem:[#allocation3 + $0xb8] sm:$0xff] }
 0x17a   : > { %1108 = vmatpush1.bf16.msra.mxu1 %v1038_v14 }
 0x17b   : > { %v1039_v15 = vld [vmem:[#allocation3 + $0xc0] sm:$0xff]  ;;  %1109 = vmatprep.subr.bf16.mxu1 %v1269_v4 }
 0x17c   : > { %1069 = vmatpush1.bf16.msra.mxu0 %v1039_v15 }
 0x17d   : > { %v1041_v54 = vld [vmem:[#allocation3 + $0xd0] sm:$0xff] }
 0x17e   : > { %1110 = vmatpush1.bf16.msra.mxu1 %v1041_v54 }
 0x17f   : > { %1085 = vmatmul.mubr.bf16.vlgmr.msra.gmra.mrb[0].mxu0 %v1217_v48 }
 0x181   : > { %1126 = vmatmul.mubr.bf16.vlgmr.msra.gmra.mrb[0].mxu1 %v1217_v48 }
 0x252   : > { %v1086_v23 = vpop.f32.mrb[0].mxu0 }
 0x253   : > { %v1088_v27 = vpop.f32.mrb[1].mxu0 }
 0x254   : > { %v1226_v55 = vpack.c.bf16 %v1088_v27, %v1086_v23  ;;  %v1090_v16 = vpop.f32.mrb[2].mxu0  ;;  %v1127_v28 = vpop.f32.mrb[0].mxu1 }
 0x255   : > { %v1227_v56 = vpack.c.bf16 %v1127_v28, %v1127_v28  ;;  %v1091_v4 = vpop.f32.mrb[3].mxu0  ;;  %v1129_v32 = vpop.f32.mrb[1].mxu1 }
 0x256   : > { %1146 = vst [vmem:[%s143_s12] sm:$0xff] %v1226_v55  ;;  %v1130_v0 = vpop.f32.mrb[2].mxu1 }
 0x257   : > { %1147 = vst [vmem:[%s143_s12 + $0x8] sm:$0xf] %v1227_v56  ;;  %v1131_v60 = vpop.f32.mrb[3].mxu1 }
 0x258 PF: > { %s12_s9 = sadd.s32 1, %s1266_s9  }
 0x259   : > { %p9_p4 = scmp.ge.s32.totalorder %s12_s9, 4  }
 0x25b   :  { %11 = sbr.rel (!%p9_p4) target bundleno = 1 (0x1), region = 58 }

</bundles_post_ra>
